<compile_context>
chip_gen: v5e
topology: v5e:2x2
jax: 0.10.0
libtpu: 0.0.40
codegen_flags: <defaults>
</compile_context>

<pallas_src>
import math
import functools

import jax
import jax.numpy as jnp
from jax.experimental import pallas as pl
from jax.experimental.pallas import tpu as pltpu


def _round_up(x, m):
    return (x + m - 1) // m * m


def _dwconv1d_kernel(x_ref, w_ref, b_ref, o_ref, *, K, M, TL, TSUB, dilation):
    """x_ref: (1, Lin_pad, Cp)  full padded sequence for this batch element
       w_ref: (K*M, Cp) f32     row k*M+m = tap k of multiplier m, per channel
       b_ref: (M, Cp)   f32     per-(m, channel) bias (zeros if use_bias=False)
       o_ref: (1, M, TL, Cp)    output tile for L-block `j` of this batch."""
    j = pl.program_id(1)
    base = pl.multiple_of(j * TL, TL)          # offset of this L-block in x_ref
    Cp = o_ref.shape[-1]
    n_sub = TL // TSUB

    # Tiny per-(tap, multiplier) weight rows / per-multiplier bias rows, hoisted
    # out of the sub-chunk loop (K*M + M rows of Cp f32 -> a few KiB).
    w_rows = [w_ref[r:r + 1, :] for r in range(K * M)]
    b_rows = [b_ref[m:m + 1, :] for m in range(M)]

    def body(s, carry):
        in_off = pl.multiple_of(base + s * TSUB, TSUB)
        out_off = pl.multiple_of(s * TSUB, TSUB)
        # f32 accumulators, initialised with the (broadcast) bias.
        accs = [jnp.broadcast_to(b_rows[m], (TSUB, Cp)) for m in range(M)]
        for k in range(K):                     # K, M small -> static unroll
            xs = x_ref[0, pl.ds(in_off + k * dilation, TSUB), :].astype(jnp.float32)
            for m in range(M):
                accs[m] = accs[m] + xs * w_rows[k * M + m]
        for m in range(M):
            o_ref[0, m, pl.ds(out_off, TSUB), :] = accs[m].astype(o_ref.dtype)
        return carry

    jax.lax.fori_loop(0, n_sub, body, 0,
                      unroll=(n_sub if n_sub <= 8 else 8))


@functools.partial(jax.jit,
                   static_argnames=("dilation", "depth_multiplier", "block_l"))
def depthwise_conv1d(x, weight, bias=None, *, dilation=1, depth_multiplier=1,
                     block_l=512):
    """x: (B, C, L) NCL; weight: (C*M, 1, K) PyTorch layout; bias: (C*M,)|None.
    Returns (B, C*M, L) with PyTorch out-channel order c*M + m."""
    B, C, L = x.shape
    CM, cin_per_group, K = weight.shape
    M = depth_multiplier
    assert cin_per_group == 1 and CM == C * M

    # PyTorch padding='same' (stride=1): left = total//2, right = total - left.
    total_pad = dilation * (K - 1)
    pad_left = total_pad // 2

    Cp = _round_up(C, 128)                            # lane-dense channel dim
    # Inner sub-chunk: one f32 accumulator ~ 8 vregs regardless of Cp.
    TSUB = max(8, ((64 * 128) // Cp) // 8 * 8)
    TL = _round_up(max(1, min(block_l, L)), TSUB)     # L tile, multiple of 8
    L_out_pad = _round_up(L, TL)
    Lin_pad = _round_up(L_out_pad + total_pad, 8)
    n_lblk = L_out_pad // TL

    # NLC activations with the 'same' left padding baked in at offset pad_left
    # (transpose + pad fuse into one XLA copy under this jit).
    x_nlc = jnp.transpose(x, (0, 2, 1))
    x_buf = jnp.zeros((B, Lin_pad, Cp), x.dtype)
    x_buf = x_buf.at[:, pad_left:pad_left + L, :C].set(x_nlc)

    # weight (C*M, 1, K): w[c*M+m, 0, k] -> row (k*M + m), channel c on lanes.
    # Parameters are kept in float32 (matches the f32 in-kernel accumulation).
    w_kmc = jnp.transpose(weight[:, 0, :].reshape(C, M, K), (2, 1, 0))  # (K,M,C)
    w_flat = jnp.zeros((K * M, Cp), jnp.float32).at[:, :C].set(
        w_kmc.reshape(K * M, C).astype(jnp.float32))
    if bias is None:
        b_flat = jnp.zeros((M, Cp), jnp.float32)
    else:
        b_mc = jnp.transpose(bias.reshape(C, M), (1, 0))                # (M, C)
        b_flat = jnp.zeros((M, Cp), jnp.float32).at[:, :C].set(
            b_mc.astype(jnp.float32))

    # VMEM budget: raise the scoped limit (default 16/32 MiB) when the
    # double-buffered input/output blocks need it, capped at the smallest
    # physical VMEM across generations (64 MiB per core on v7x).
    itemsize = x.dtype.itemsize
    vmem_need = (2 * Lin_pad * Cp * itemsize           # resident input block
                 + 2 * M * TL * Cp * itemsize          # output block
                 + 2 * (K * M + M) * Cp * 4)           # params
    compiler_kwargs = dict(dimension_semantics=("parallel", "parallel"))
    if vmem_need > 24 * 1024 * 1024:
        # NOTE: for sequences whose resident (Lin_pad, Cp) block would exceed
        # this cap, stream x in halo windows with manual make_async_copy.
        compiler_kwargs["vmem_limit_bytes"] = int(
            min(vmem_need + 4 * 1024 * 1024, 64 * 1024 * 1024))

    kernel = functools.partial(_dwconv1d_kernel, K=K, M=M, TL=TL, TSUB=TSUB,
                               dilation=dilation)
    y = pl.pallas_call(
        kernel,
        out_shape=jax.ShapeDtypeStruct((B, M, L_out_pad, Cp), x.dtype),
        grid=(B, n_lblk),
        in_specs=[
            # Full padded sequence per batch element; the index_map ignores the
            # (inner) L-block axis, so the block is DMA'd once per batch
            # element and stays resident across the whole L sweep.
            pl.BlockSpec((1, Lin_pad, Cp), lambda b, i: (b, 0, 0)),
            pl.BlockSpec((K * M, Cp), lambda b, i: (0, 0)),
            pl.BlockSpec((M, Cp), lambda b, i: (0, 0)),
        ],
        out_specs=pl.BlockSpec((1, M, TL, Cp), lambda b, i: (b, 0, i, 0)),
        compiler_params=pltpu.CompilerParams(**compiler_kwargs),
    )(x_buf, w_flat, b_flat)

    # (B, M, L_out_pad, Cp) -> PyTorch NCL with out-channel order c*M + m
    # (slice + transpose + reshape fuse into one XLA pass under this jit).
    y = y[:, :, :L, :C]                        # (B, M, L, C)
    y = jnp.transpose(y, (0, 3, 1, 2))         # (B, C, M, L)
    return y.reshape(B, C * M, L)


if __name__ == "__main__":
    key = jax.random.PRNGKey(0)
    kx, kw, kb, kx2, kw2 = jax.random.split(key, 5)

    # Case 1: DepthwiseConv1D(dim_in=64, kernel_size=3, dilation_rate=2,
    #                         depth_multiplier=2, padding='same', use_bias=False)
    B, C, L = 2, 64, 128
    K, dilation, M = 3, 2, 2
    x = jax.random.normal(kx, (B, C, L), jnp.float32)
    w = jax.random.normal(kw, (C * M, 1, K), jnp.float32) / math.sqrt(K)
    y = jax.block_until_ready(
        depthwise_conv1d(x, w, dilation=dilation, depth_multiplier=M))
    assert y.shape == (B, C * M, L), y.shape
    total = dilation * (K - 1)
    ref = jax.lax.conv_general_dilated(
        x, w, window_strides=(1,),
        padding=[(total // 2, total - total // 2)],
        rhs_dilation=(dilation,),
        dimension_numbers=("NCH", "OIH", "NCH"),
        feature_group_count=C)
    assert jnp.allclose(y, ref, rtol=1e-5, atol=1e-5)
    assert bool(jnp.all(jnp.isfinite(y)))

    # Case 2: bias enabled, dilation 1, depth_multiplier 1, L not a tile multiple.
    B2, C2, L2 = 2, 32, 200
    K2, d2, M2 = 3, 1, 1
    x2 = jax.random.normal(kx2, (B2, C2, L2), jnp.float32)
    w2 = jax.random.normal(kw2, (C2 * M2, 1, K2), jnp.float32) / math.sqrt(K2)
    b2 = jax.random.normal(kb, (C2 * M2,), jnp.float32)
    y2 = jax.block_until_ready(
        depthwise_conv1d(x2, w2, b2, dilation=d2, depth_multiplier=M2))
    assert y2.shape == (B2, C2 * M2, L2), y2.shape
    total2 = d2 * (K2 - 1)
    ref2 = jax.lax.conv_general_dilated(
        x2, w2, window_strides=(1,),
        padding=[(total2 // 2, total2 - total2 // 2)],
        rhs_dilation=(d2,),
        dimension_numbers=("NCH", "OIH", "NCH"),
        feature_group_count=C2) + b2[None, :, None]
    assert jnp.allclose(y2, ref2, rtol=1e-5, atol=1e-5)
    assert bool(jnp.all(jnp.isfinite(y2)))

    print("KERNEL_OK")
</pallas_src>

<mosaic_0001>
module attributes {stable_mosaic.version = 11 : i64} {
  func.func @_dwconv1d_kernel(%arg0: i32, %arg1: i32, %arg2: memref<1x136x128xf32, #tpu.memory_space<vmem>>, %arg3: memref<6x128xf32, #tpu.memory_space<vmem>>, %arg4: memref<2x128xf32, #tpu.memory_space<vmem>>, %arg5: memref<1x2x128x128xf32, #tpu.memory_space<vmem>>) attributes {dimension_semantics = [#tpu.dimension_semantics<parallel>, #tpu.dimension_semantics<parallel>], iteration_bounds = array<i64: 2, 1>, scalar_prefetch = 0 : i64, scratch_operands = 0 : i64, tpu.core_type = #tpu.core_type<tc>, window_params = [{transform_indices = @transform_0, window_bounds = array<i64: 1, 136, 128>}, {pipeline_mode = #tpu.pipeline_mode<synchronous>, transform_indices = @transform_1, window_bounds = array<i64: 6, 128>}, {pipeline_mode = #tpu.pipeline_mode<synchronous>, transform_indices = @transform_2, window_bounds = array<i64: 2, 128>}, {transform_indices = @transform_3, window_bounds = array<i64: 1, 2, 128, 128>}]} {
    %c128_i32 = arith.constant 128 : i32
    %0 = arith.muli %arg1, %c128_i32 : i32
    %1 = tpu.assume_multiple %0, 128 : i32
    %c0 = arith.constant 0 : index
    %c0_0 = arith.constant 0 : index
    %2 = vector.load %arg3[%c0, %c0_0] : memref<6x128xf32, #tpu.memory_space<vmem>>, vector<1x128xf32>
    %c1 = arith.constant 1 : index
    %c0_1 = arith.constant 0 : index
    %3 = vector.load %arg3[%c1, %c0_1] : memref<6x128xf32, #tpu.memory_space<vmem>>, vector<1x128xf32>
    %c2 = arith.constant 2 : index
    %c0_2 = arith.constant 0 : index
    %4 = vector.load %arg3[%c2, %c0_2] : memref<6x128xf32, #tpu.memory_space<vmem>>, vector<1x128xf32>
    %c3 = arith.constant 3 : index
    %c0_3 = arith.constant 0 : index
    %5 = vector.load %arg3[%c3, %c0_3] : memref<6x128xf32, #tpu.memory_space<vmem>>, vector<1x128xf32>
    %c4 = arith.constant 4 : index
    %c0_4 = arith.constant 0 : index
    %6 = vector.load %arg3[%c4, %c0_4] : memref<6x128xf32, #tpu.memory_space<vmem>>, vector<1x128xf32>
    %c5 = arith.constant 5 : index
    %c0_5 = arith.constant 0 : index
    %7 = vector.load %arg3[%c5, %c0_5] : memref<6x128xf32, #tpu.memory_space<vmem>>, vector<1x128xf32>
    %c0_6 = arith.constant 0 : index
    %c0_7 = arith.constant 0 : index
    %8 = vector.load %arg4[%c0_6, %c0_7] : memref<2x128xf32, #tpu.memory_space<vmem>>, vector<1x128xf32>
    %c1_8 = arith.constant 1 : index
    %c0_9 = arith.constant 0 : index
    %9 = vector.load %arg4[%c1_8, %c0_9] : memref<2x128xf32, #tpu.memory_space<vmem>>, vector<1x128xf32>
    %c0_i32 = arith.constant 0 : i32
    %c64_i32 = arith.constant 64 : i32
    %10 = arith.muli %c0_i32, %c64_i32 : i32
    %11 = arith.addi %1, %10 : i32
    %12 = tpu.assume_multiple %11, 64 : i32
    %c64_i32_10 = arith.constant 64 : i32
    %13 = arith.muli %c0_i32, %c64_i32_10 : i32
    %14 = tpu.assume_multiple %13, 64 : i32
    %15 = vector.shape_cast %8 : vector<1x128xf32> to vector<1x128xf32>
    %16 = vector.broadcast %15 : vector<1x128xf32> to vector<64x128xf32>
    %17 = vector.shape_cast %9 : vector<1x128xf32> to vector<1x128xf32>
    %18 = vector.broadcast %17 : vector<1x128xf32> to vector<64x128xf32>
    %c0_i32_11 = arith.constant 0 : i32
    %19 = arith.addi %12, %c0_i32_11 : i32
    %c0_12 = arith.constant 0 : index
    %20 = arith.index_cast %19 : i32 to index
    %c0_13 = arith.constant 0 : index
    %21 = vector.load %arg2[%c0_12, %20, %c0_13] : memref<1x136x128xf32, #tpu.memory_space<vmem>>, vector<1x64x128xf32>
    %22 = vector.shape_cast %21 : vector<1x64x128xf32> to vector<64x128xf32>
    %23 = vector.broadcast %2 : vector<1x128xf32> to vector<64x128xf32>
    %24 = arith.mulf %22, %23 : vector<64x128xf32>
    %25 = arith.addf %16, %24 : vector<64x128xf32>
    %26 = vector.broadcast %3 : vector<1x128xf32> to vector<64x128xf32>
    %27 = arith.mulf %22, %26 : vector<64x128xf32>
    %28 = arith.addf %18, %27 : vector<64x128xf32>
    %c2_i32 = arith.constant 2 : i32
    %29 = arith.addi %12, %c2_i32 : i32
    %c0_14 = arith.constant 0 : index
    %30 = arith.index_cast %29 : i32 to index
    %c0_15 = arith.constant 0 : index
    %31 = vector.load %arg2[%c0_14, %30, %c0_15] : memref<1x136x128xf32, #tpu.memory_space<vmem>>, vector<1x64x128xf32>
    %32 = vector.shape_cast %31 : vector<1x64x128xf32> to vector<64x128xf32>
    %33 = vector.broadcast %4 : vector<1x128xf32> to vector<64x128xf32>
    %34 = arith.mulf %32, %33 : vector<64x128xf32>
    %35 = arith.addf %25, %34 : vector<64x128xf32>
    %36 = vector.broadcast %5 : vector<1x128xf32> to vector<64x128xf32>
    %37 = arith.mulf %32, %36 : vector<64x128xf32>
    %38 = arith.addf %28, %37 : vector<64x128xf32>
    %c4_i32 = arith.constant 4 : i32
    %39 = arith.addi %12, %c4_i32 : i32
    %c0_16 = arith.constant 0 : index
    %40 = arith.index_cast %39 : i32 to index
    %c0_17 = arith.constant 0 : index
    %41 = vector.load %arg2[%c0_16, %40, %c0_17] : memref<1x136x128xf32, #tpu.memory_space<vmem>>, vector<1x64x128xf32>
    %42 = vector.shape_cast %41 : vector<1x64x128xf32> to vector<64x128xf32>
    %43 = vector.broadcast %6 : vector<1x128xf32> to vector<64x128xf32>
    %44 = arith.mulf %42, %43 : vector<64x128xf32>
    %45 = arith.addf %35, %44 : vector<64x128xf32>
    %46 = vector.broadcast %7 : vector<1x128xf32> to vector<64x128xf32>
    %47 = arith.mulf %42, %46 : vector<64x128xf32>
    %48 = arith.addf %38, %47 : vector<64x128xf32>
    %c0_18 = arith.constant 0 : index
    %c0_19 = arith.constant 0 : index
    %49 = arith.index_cast %14 : i32 to index
    %c0_20 = arith.constant 0 : index
    %50 = vector.load %arg5[%c0_18, %c0_19, %49, %c0_20] : memref<1x2x128x128xf32, #tpu.memory_space<vmem>>, vector<1x1x64x128xf32>
    %51 = vector.shape_cast %50 : vector<1x1x64x128xf32> to vector<64x128xf32>
    %52 = vector.shape_cast %45 : vector<64x128xf32> to vector<1x1x64x128xf32>
    tpu.vector_store %arg5[%c0_18, %c0_19, %49, %c0_20], %52 {strides = array<i32>} : memref<1x2x128x128xf32, #tpu.memory_space<vmem>>, vector<1x1x64x128xf32>,
    %c0_21 = arith.constant 0 : index
    %c1_22 = arith.constant 1 : index
    %53 = arith.index_cast %14 : i32 to index
    %c0_23 = arith.constant 0 : index
    %54 = vector.load %arg5[%c0_21, %c1_22, %53, %c0_23] : memref<1x2x128x128xf32, #tpu.memory_space<vmem>>, vector<1x1x64x128xf32>
    %55 = vector.shape_cast %54 : vector<1x1x64x128xf32> to vector<64x128xf32>
    %56 = vector.shape_cast %48 : vector<64x128xf32> to vector<1x1x64x128xf32>
    tpu.vector_store %arg5[%c0_21, %c1_22, %53, %c0_23], %56 {strides = array<i32>} : memref<1x2x128x128xf32, #tpu.memory_space<vmem>>, vector<1x1x64x128xf32>,
    %c1_i32 = arith.constant 1 : i32
    %c64_i32_24 = arith.constant 64 : i32
    %57 = arith.muli %c1_i32, %c64_i32_24 : i32
    %58 = arith.addi %1, %57 : i32
    %59 = tpu.assume_multiple %58, 64 : i32
    %c64_i32_25 = arith.constant 64 : i32
    %60 = arith.muli %c1_i32, %c64_i32_25 : i32
    %61 = tpu.assume_multiple %60, 64 : i32
    %62 = vector.shape_cast %8 : vector<1x128xf32> to vector<1x128xf32>
    %63 = vector.broadcast %62 : vector<1x128xf32> to vector<64x128xf32>
    %64 = vector.shape_cast %9 : vector<1x128xf32> to vector<1x128xf32>
    %65 = vector.broadcast %64 : vector<1x128xf32> to vector<64x128xf32>
    %c0_i32_26 = arith.constant 0 : i32
    %66 = arith.addi %59, %c0_i32_26 : i32
    %c0_27 = arith.constant 0 : index
    %67 = arith.index_cast %66 : i32 to index
    %c0_28 = arith.constant 0 : index
    %68 = vector.load %arg2[%c0_27, %67, %c0_28] : memref<1x136x128xf32, #tpu.memory_space<vmem>>, vector<1x64x128xf32>
    %69 = vector.shape_cast %68 : vector<1x64x128xf32> to vector<64x128xf32>
    %70 = vector.broadcast %2 : vector<1x128xf32> to vector<64x128xf32>
    %71 = arith.mulf %69, %70 : vector<64x128xf32>
    %72 = arith.addf %63, %71 : vector<64x128xf32>
    %73 = vector.broadcast %3 : vector<1x128xf32> to vector<64x128xf32>
    %74 = arith.mulf %69, %73 : vector<64x128xf32>
    %75 = arith.addf %65, %74 : vector<64x128xf32>
    %c2_i32_29 = arith.constant 2 : i32
    %76 = arith.addi %59, %c2_i32_29 : i32
    %c0_30 = arith.constant 0 : index
    %77 = arith.index_cast %76 : i32 to index
    %c0_31 = arith.constant 0 : index
    %78 = vector.load %arg2[%c0_30, %77, %c0_31] : memref<1x136x128xf32, #tpu.memory_space<vmem>>, vector<1x64x128xf32>
    %79 = vector.shape_cast %78 : vector<1x64x128xf32> to vector<64x128xf32>
    %80 = vector.broadcast %4 : vector<1x128xf32> to vector<64x128xf32>
    %81 = arith.mulf %79, %80 : vector<64x128xf32>
    %82 = arith.addf %72, %81 : vector<64x128xf32>
    %83 = vector.broadcast %5 : vector<1x128xf32> to vector<64x128xf32>
    %84 = arith.mulf %79, %83 : vector<64x128xf32>
    %85 = arith.addf %75, %84 : vector<64x128xf32>
    %c4_i32_32 = arith.constant 4 : i32
    %86 = arith.addi %59, %c4_i32_32 : i32
    %c0_33 = arith.constant 0 : index
    %87 = arith.index_cast %86 : i32 to index
    %c0_34 = arith.constant 0 : index
    %88 = vector.load %arg2[%c0_33, %87, %c0_34] : memref<1x136x128xf32, #tpu.memory_space<vmem>>, vector<1x64x128xf32>
    %89 = vector.shape_cast %88 : vector<1x64x128xf32> to vector<64x128xf32>
    %90 = vector.broadcast %6 : vector<1x128xf32> to vector<64x128xf32>
    %91 = arith.mulf %89, %90 : vector<64x128xf32>
    %92 = arith.addf %82, %91 : vector<64x128xf32>
    %93 = vector.broadcast %7 : vector<1x128xf32> to vector<64x128xf32>
    %94 = arith.mulf %89, %93 : vector<64x128xf32>
    %95 = arith.addf %85, %94 : vector<64x128xf32>
    %c0_35 = arith.constant 0 : index
    %c0_36 = arith.constant 0 : index
    %96 = arith.index_cast %61 : i32 to index
    %c0_37 = arith.constant 0 : index
    %97 = vector.load %arg5[%c0_35, %c0_36, %96, %c0_37] : memref<1x2x128x128xf32, #tpu.memory_space<vmem>>, vector<1x1x64x128xf32>
    %98 = vector.shape_cast %97 : vector<1x1x64x128xf32> to vector<64x128xf32>
    %99 = vector.shape_cast %92 : vector<64x128xf32> to vector<1x1x64x128xf32>
    tpu.vector_store %arg5[%c0_35, %c0_36, %96, %c0_37], %99 {strides = array<i32>} : memref<1x2x128x128xf32, #tpu.memory_space<vmem>>, vector<1x1x64x128xf32>,
    %c0_38 = arith.constant 0 : index
    %c1_39 = arith.constant 1 : index
    %100 = arith.index_cast %61 : i32 to index
    %c0_40 = arith.constant 0 : index
    %101 = vector.load %arg5[%c0_38, %c1_39, %100, %c0_40] : memref<1x2x128x128xf32, #tpu.memory_space<vmem>>, vector<1x1x64x128xf32>
    %102 = vector.shape_cast %101 : vector<1x1x64x128xf32> to vector<64x128xf32>
    %103 = vector.shape_cast %95 : vector<64x128xf32> to vector<1x1x64x128xf32>
    tpu.vector_store %arg5[%c0_38, %c1_39, %100, %c0_40], %103 {strides = array<i32>} : memref<1x2x128x128xf32, #tpu.memory_space<vmem>>, vector<1x1x64x128xf32>,
    %c2_i32_41 = arith.constant 2 : i32
    return
  }
  func.func @transform_0(%arg0: i32, %arg1: i32) -> (i32, i32, i32) {
    %c0_i32 = arith.constant 0 : i32
    %c0_i32_0 = arith.constant 0 : i32
    %c0_i32_1 = arith.constant 0 : i32
    return %arg0, %c0_i32, %c0_i32_0 : i32, i32, i32
  }
  func.func @transform_1(%arg0: i32, %arg1: i32) -> (i32, i32) {
    %c0_i32 = arith.constant 0 : i32
    %c0_i32_0 = arith.constant 0 : i32
    %c0_i32_1 = arith.constant 0 : i32
    return %c0_i32, %c0_i32_0 : i32, i32
  }
  func.func @transform_2(%arg0: i32, %arg1: i32) -> (i32, i32) {
    %c0_i32 = arith.constant 0 : i32
    %c0_i32_0 = arith.constant 0 : i32
    %c0_i32_1 = arith.constant 0 : i32
    return %c0_i32, %c0_i32_0 : i32, i32
  }
  func.func @transform_3(%arg0: i32, %arg1: i32) -> (i32, i32, i32, i32) {
    %c0_i32 = arith.constant 0 : i32
    %c0_i32_0 = arith.constant 0 : i32
    %c0_i32_1 = arith.constant 0 : i32
    return %arg0, %c0_i32, %arg1, %c0_i32_0 : i32, i32, i32, i32
  }
}

</mosaic_0001>

<bundles_post_ra>
// kernel: depthwise_conv1d.1
= control target key start
LH: loop header
LB: loop body
LE: loop exit
PB: predicated region body
PF: predicated region fallthrough
CT: control target
= control target key end

     0   :  { %s751_s12 = smov 0   ;;  %s753_s13 = smov 0   ;;  %s1230_s0 = inlined_call_operand.vmem [shape: f32[2,136,128], index: 0, kind: input, shape index: {}]   ;;  %s1231_s1 = inlined_call_operand.vmem [shape: f32[6,128], index: 1, kind: input, shape index: {}]   ;;  %s1232_s2 = inlined_call_operand.vmem [shape: f32[2,128], index: 2, kind: input, shape index: {}]   ;;  %s1233_s3 = inlined_call_operand.vmem [shape: f32[2,2,128,128], index: 3, kind: output, shape index: {}]  }
   0x1   :  { %s755_s14 = smov 0  }
   0x2 LB: > { %s25_s15 = sadd.s32 1, %s725_s13  ;;  %p603_p0 = scmp.ge.s32.totalorder %s729_s14, 1  ;;  %s729_s14 = sphi %s755_s14, %s13_s14   ;;  %s725_s13 = sphi %s753_s13, %s1235_s13   ;;  %s721_s12 = sphi %s751_s12, %s1234_s12  }
   0x3   : > { %p27_p1 = scmp.ge.s32.totalorder %s25_s15, 2  ;;  %p151_p2 = scmp.lt.s32.totalorder %s729_s14, 3 }
   0x5   : > { %s1237_s15 = smov (%p27_p1, %s25_s15), 0  ;;  %p152_p3 = pnand %p603_p0, %p151_p2 }
   0x6   : > { %p179_p4 = scmp.lt.s32.totalorder (!%p152_p3), %s721_s12, 1 }
   0x7   : > { %155 = sbr.rel (%p152_p3) target bundleno = 71 (0x47), region = 32 }
   0xc   : > { %s1239_s12 = smov (!%p179_p4, %s721_s12), 1  ;;  %v774_v0 = vld [vmem:[%s1231_s1] ss:$0 sm:$0xff]  ;;  %v779_v1 = vld [vmem:[%s1231_s1 + $0x2] ss:$0 sm:$0xff] }
   0xd   : > { %v784_v2 = vld [vmem:[%s1231_s1 + $0x4] ss:$0 sm:$0xff]  ;;  %s674_s22 = smul.u32 136, %s1239_s12  ;;  %v790_v3 = vld [vmem:[%s1231_s1 + $0x1] ss:$0 sm:$0xff]  ;;  %s673_s5 = sshll.u32 %s1239_s12, 8 }
   0xe   : > { %v795_v4 = vld [vmem:[%s1231_s1 + $0x3] ss:$0 sm:$0xff]  ;;  %v805_v5 = vld [vmem:[%s1232_s2] ss:$0 sm:$0xff]  ;;  %s896_s8 = scalar_lea.vmem %s1233_s3, %s673_s5  ;;  %v921_v56 = vld [vmem:[%s1232_s2 + $0x1] ss:$0 sm:$0xff] }
   0xf   : > { %s800_s29 = scalar_lea.vmem %s1230_s0, %s674_s22  ;;  %v935_v63 = vld [vmem:[%s1231_s1 + $0x5] ss:$0 sm:$0xff] }
  0x10   : > { %v206_v6 = vld [vmem:[%s800_s29] sm:$0xff]  ;;  %v817_v12 = vld [vmem:[%s800_s29 + $0x8] sm:$0xff]  ;;  %v835_v19 = vld [vmem:[%s800_s29 + $0x10] sm:$0xff] }
  0x11   : > { %v607_v7 = vld [vmem:[%s800_s29 + $0x2] sm:$0xff]  ;;  %v215_v9 = vmul.f32 %v774_v0, %v206_v6  ;;  %v820_v13 = vld [vmem:[%s800_s29 + $0xa] sm:$0xff]  ;;  %v826_v15 = vmul.f32 %v790_v3, %v206_v6  ;;  %v216_v16 = vmul.f32 %v774_v0, %v817_v12  ;;  %v838_v20 = vld [vmem:[%s800_s29 + $0x12] sm:$0xff]  ;;  %v217_v24 = vmul.f32 %v774_v0, %v835_v19 }
  0x12   : > { %v810_v8 = vld [vmem:[%s800_s29 + $0x4] sm:$0xff]  ;;  %v259_v10 = vmul.f32 %v779_v1, %v607_v7  ;;  %v823_v14 = vld [vmem:[%s800_s29 + $0xc] sm:$0xff]  ;;  %v260_v17 = vmul.f32 %v779_v1, %v820_v13  ;;  %v841_v21 = vld [vmem:[%s800_s29 + $0x14] sm:$0xff]  ;;  %v844_v22 = vmul.f32 %v795_v4, %v607_v7  ;;  %v261_v25 = vmul.f32 %v779_v1, %v838_v20 }
  0x13   : > { %v303_v11 = vmul.f32 %v784_v2, %v810_v8  ;;  %v304_v18 = vmul.f32 %v784_v2, %v823_v14  ;;  %v223_v23 = vadd.f32 %v805_v5, %v215_v9  ;;  %v305_v26 = vmul.f32 %v784_v2, %v841_v21  ;;  %v855_v27 = vld [vmem:[%s800_s29 + $0x18] sm:$0xff]  ;;  %v871_v34 = vld [vmem:[%s800_s29 + $0x20] sm:$0xff]  ;;  %v885_v41 = vld [vmem:[%s800_s29 + $0x28] sm:$0xff] }
  0x14   : > { %v858_v28 = vld [vmem:[%s800_s29 + $0x1a] sm:$0xff]  ;;  %v224_v30 = vadd.f32 %v805_v5, %v216_v16  ;;  %v218_v31 = vmul.f32 %v774_v0, %v855_v27  ;;  %v874_v35 = vld [vmem:[%s800_s29 + $0x22] sm:$0xff]  ;;  %v225_v38 = vadd.f32 %v805_v5, %v217_v24  ;;  %v219_v39 = vmul.f32 %v774_v0, %v871_v34  ;;  %v888_v42 = vld [vmem:[%s800_s29 + $0x2a] sm:$0xff] }
  0x15   : > { %v861_v29 = vld [vmem:[%s800_s29 + $0x1c] sm:$0xff]  ;;  %v262_v32 = vmul.f32 %v779_v1, %v858_v28  ;;  %v877_v36 = vld [vmem:[%s800_s29 + $0x24] sm:$0xff]  ;;  %v267_v37 = vadd.f32 %v259_v10, %v223_v23  ;;  %v263_v40 = vmul.f32 %v779_v1, %v874_v35  ;;  %v891_v43 = vld [vmem:[%s800_s29 + $0x2c] sm:$0xff]  ;;  %v220_v47 = vmul.f32 %v774_v0, %v885_v41 }
  0x16   : > { %v306_v33 = vmul.f32 %v784_v2, %v861_v29  ;;  %v268_v44 = vadd.f32 %v260_v17, %v224_v30  ;;  %v226_v45 = vadd.f32 %v805_v5, %v218_v31  ;;  %v307_v46 = vmul.f32 %v784_v2, %v877_v36  ;;  %v904_v48 = vld [vmem:[%s800_s29 + $0x30] sm:$0xff]  ;;  %v916_v55 = vld [vmem:[%s800_s29 + $0x38] sm:$0xff] }
  0x17   : > { %v907_v49 = vld [vmem:[%s800_s29 + $0x32] sm:$0xff]  ;;  %v311_v50 = vadd.f32 %v303_v11, %v267_v37  ;;  %v269_v51 = vadd.f32 %v261_v25, %v225_v38  ;;  %v227_v52 = vadd.f32 %v805_v5, %v219_v39  ;;  %v264_v53 = vmul.f32 %v779_v1, %v888_v42  ;;  %v927_v61 = vld [vmem:[%s800_s29 + $0x3a] sm:$0xff] }
  0x18   : > { %v913_v54 = vld [vmem:[%s800_s29 + $0x34] sm:$0xff]  ;;  %v312_v57 = vadd.f32 %v304_v18, %v268_v44  ;;  %v270_v58 = vadd.f32 %v262_v32, %v226_v45  ;;  %v228_v59 = vadd.f32 %v805_v5, %v220_v47  ;;  %v308_v60 = vmul.f32 %v784_v2, %v891_v43  ;;  %v930_v62 = vld [vmem:[%s800_s29 + $0x3c] sm:$0xff] }
  0x19   : > { %336 = vst [vmem:[%s896_s8] sm:$0xff] %v311_v50  ;;  %v313_v6 = vadd.f32 %v305_v26, %v269_v51  ;;  %v271_v7 = vadd.f32 %v263_v40, %v227_v52  ;;  %v221_v9 = vmul.f32 %v774_v0, %v904_v48  ;;  %v265_v10 = vmul.f32 %v779_v1, %v907_v49 }
  0x1a   : > { %337 = vst [vmem:[%s896_s8 + $0x8] sm:$0xff] %v312_v57  ;;  %v314_v11 = vadd.f32 %v306_v33, %v270_v58  ;;  %v272_v16 = vadd.f32 %v264_v53, %v228_v59  ;;  %v309_v17 = vmul.f32 %v784_v2, %v913_v54  ;;  %v222_v18 = vmul.f32 %v774_v0, %v916_v55 }
  0x1b   : > { %338 = vst [vmem:[%s896_s8 + $0x10] sm:$0xff] %v313_v6  ;;  %v315_v23 = vadd.f32 %v307_v46, %v271_v7  ;;  %v229_v24 = vadd.f32 %v805_v5, %v221_v9  ;;  %v266_v25 = vmul.f32 %v779_v1, %v927_v61  ;;  %v310_v26 = vmul.f32 %v784_v2, %v930_v62  ;;  %v1006_v7 = vld [vmem:[%s800_s29 + $0x42] sm:$0xff] }
  0x1c   : > { %339 = vst [vmem:[%s896_s8 + $0x18] sm:$0xff] %v314_v11  ;;  %v316_v30 = vadd.f32 %v308_v60, %v272_v16  ;;  %v230_v31 = vadd.f32 %v805_v5, %v222_v18  ;;  %v240_v32 = vadd.f32 %v921_v56, %v826_v15  ;;  %v320_v33 = vmul.f32 %v935_v63, %v810_v8  ;;  %v1014_v11 = vld [vmem:[%s800_s29 + $0x44] sm:$0xff] }
  0x1d   : > { %340 = vst [vmem:[%s896_s8 + $0x20] sm:$0xff] %v315_v23  ;;  %v273_v37 = vadd.f32 %v265_v10, %v229_v24  ;;  %v233_v38 = vmul.f32 %v790_v3, %v817_v12  ;;  %v277_v39 = vmul.f32 %v795_v4, %v820_v13  ;;  %v321_v40 = vmul.f32 %v935_v63, %v823_v14  ;;  %v1026_v23 = vld [vmem:[%s800_s29 + $0x4a] sm:$0xff] }
  0x1e   : > { %341 = vst [vmem:[%s896_s8 + $0x28] sm:$0xff] %v316_v30  ;;  %v274_v44 = vadd.f32 %v266_v25, %v230_v31  ;;  %v284_v45 = vadd.f32 %v844_v22, %v240_v32  ;;  %v234_v8 = vmul.f32 %v790_v3, %v835_v19  ;;  %v278_v15 = vmul.f32 %v795_v4, %v838_v20  ;;  %v1042_v30 = vld [vmem:[%s800_s29 + $0x52] sm:$0xff] }
  0x1f   : > { %v317_v46 = vadd.f32 %v309_v17, %v273_v37  ;;  %v241_v12 = vadd.f32 %v921_v56, %v233_v38  ;;  %v322_v13 = vmul.f32 %v935_v63, %v841_v21  ;;  %v235_v14 = vmul.f32 %v790_v3, %v855_v27  ;;  %v1048_v37 = vld [vmem:[%s800_s29 + $0x54] sm:$0xff] }
  0x20   : > { %v318_v47 = vadd.f32 %v310_v26, %v274_v44  ;;  %v328_v50 = vadd.f32 %v320_v33, %v284_v45  ;;  %v242_v22 = vadd.f32 %v921_v56, %v234_v8  ;;  %v279_v19 = vmul.f32 %v795_v4, %v858_v28  ;;  %v1039_v26 = vld [vmem:[%s800_s29 + $0x50] sm:$0xff]  ;;  %v1051_v38 = vld [vmem:[%s800_s29 + $0x58] sm:$0xff] }
  0x21   : > { %342 = vst [vmem:[%s896_s8 + $0x30] sm:$0xff] %v317_v46  ;;  %v285_v51 = vadd.f32 %v277_v39, %v241_v12  ;;  %v243_v20 = vadd.f32 %v921_v56, %v235_v14  ;;  %v323_v52 = vmul.f32 %v935_v63, %v861_v29  ;;  %v236_v21 = vmul.f32 %v790_v3, %v871_v34  ;;  %v1062_v8 = vld [vmem:[%s800_s29 + $0x5a] sm:$0xff] }
  0x22   : > { %343 = vst [vmem:[%s896_s8 + $0x38] sm:$0xff] %v318_v47  ;;  %v286_v27 = vadd.f32 %v278_v15, %v242_v22  ;;  %v280_v53 = vmul.f32 %v795_v4, %v874_v35  ;;  %v324_v28 = vmul.f32 %v935_v63, %v877_v36  ;;  %v237_v57 = vmul.f32 %v790_v3, %v885_v41  ;;  %v1003_v41 = vld [vmem:[%s800_s29 + $0x40] sm:$0xff] }
  0x23   : > { %623 = vst [vmem:[%s896_s8 + $0x80] sm:$0xff] %v328_v50  ;;  %v329_v29 = vadd.f32 %v321_v40, %v285_v51  ;;  %v287_v58 = vadd.f32 %v279_v19, %v243_v20  ;;  %v244_v34 = vadd.f32 %v921_v56, %v236_v21  ;;  %v281_v59 = vmul.f32 %v795_v4, %v888_v42  ;;  %v1065_v15 = vld [vmem:[%s800_s29 + $0x5c] sm:$0xff]  ;;  %v1087_v21 = vld [vmem:[%s800_s29 + $0x68] sm:$0xff] }
  0x24   : > { %v330_v60 = vadd.f32 %v322_v13, %v286_v27  ;;  %v245_v6 = vadd.f32 %v921_v56, %v237_v57  ;;  %v325_v35 = vmul.f32 %v935_v63, %v891_v43  ;;  %v238_v36 = vmul.f32 %v790_v3, %v904_v48  ;;  %v1073_v47 = vld [vmem:[%s800_s29 + $0x60] sm:$0xff] }
  0x25   : > { %624 = vst [vmem:[%s896_s8 + $0x88] sm:$0xff] %v329_v29  ;;  %v331_v9 = vadd.f32 %v323_v52, %v287_v58  ;;  %v288_v42 = vadd.f32 %v280_v53, %v244_v34  ;;  %v282_v10 = vmul.f32 %v795_v4, %v907_v49  ;;  %v326_v43 = vmul.f32 %v935_v63, %v913_v54  ;;  %v1023_v49 = vld [vmem:[%s800_s29 + $0x48] sm:$0xff] }
  0x26   : > { %625 = vst [vmem:[%s896_s8 + $0x90] sm:$0xff] %v330_v60  ;;  %v289_v48 = vadd.f32 %v281_v59, %v245_v6  ;;  %v246_v16 = vadd.f32 %v921_v56, %v238_v36  ;;  %v239_v17 = vmul.f32 %v790_v3, %v916_v55  ;;  %v283_v18 = vmul.f32 %v795_v4, %v927_v61  ;;  %v1029_v54 = vld [vmem:[%s800_s29 + $0x4c] sm:$0xff]  ;;  %v1081_v20 = vld [vmem:[%s800_s29 + $0x62] sm:$0xff] }
  0x27   : > { %626 = vst [vmem:[%s896_s8 + $0x98] sm:$0xff] %v331_v9  ;;  %v332_v24 = vadd.f32 %v324_v28, %v288_v42  ;;  %v327_v25 = vmul.f32 %v935_v63, %v930_v62  ;;  %v364_v55 = vmul.f32 %v774_v0, %v1003_v41  ;;  %v406_v61 = vmul.f32 %v779_v1, %v1006_v7  ;;  %v1084_v52 = vld [vmem:[%s800_s29 + $0x64] sm:$0xff]  ;;  %v1102_v6 = vld [vmem:[%s800_s29 + $0x6c] sm:$0xff] }
  0x28   : > { %v333_v31 = vadd.f32 %v325_v35, %v289_v48  ;;  %v290_v32 = vadd.f32 %v282_v10, %v246_v16  ;;  %v247_v33 = vadd.f32 %v921_v56, %v239_v17  ;;  %v448_v62 = vmul.f32 %v784_v2, %v1014_v11  ;;  %v1096_v29 = vld [vmem:[%s800_s29 + $0x6a] sm:$0xff]  ;;  %v1118_v48 = vld [vmem:[%s800_s29 + $0x74] sm:$0xff] }
  0x29   : > { %627 = vst [vmem:[%s896_s8 + $0xa0] sm:$0xff] %v332_v24  ;;  %v372_v39 = vadd.f32 %v805_v5, %v364_v55  ;;  %v365_v40 = vmul.f32 %v774_v0, %v1023_v49  ;;  %v407_v44 = vmul.f32 %v779_v1, %v1026_v23  ;;  %v449_v45 = vmul.f32 %v784_v2, %v1029_v54  ;;  %v1105_v35 = vld [vmem:[%s800_s29 + $0x70] sm:$0xff]  ;;  %v1128_v55 = vld [vmem:[%s800_s29 + $0x7a] sm:$0xff] }
  0x2a   : > { %628 = vst [vmem:[%s896_s8 + $0xa8] sm:$0xff] %v333_v31  ;;  %v334_v46 = vadd.f32 %v326_v43, %v290_v32  ;;  %v291_v12 = vadd.f32 %v283_v18, %v247_v33  ;;  %v366_v13 = vmul.f32 %v774_v0, %v1039_v26  ;;  %v408_v14 = vmul.f32 %v779_v1, %v1042_v30  ;;  %v1115_v43 = vld [vmem:[%s800_s29 + $0x72] sm:$0xff] }
  0x2b   : > { %v414_v50 = vadd.f32 %v406_v61, %v372_v39  ;;  %v373_v22 = vadd.f32 %v805_v5, %v365_v40  ;;  %v450_v19 = vmul.f32 %v784_v2, %v1048_v37  ;;  %v367_v51 = vmul.f32 %v774_v0, %v1051_v38 }
  0x2c   : > { %629 = vst [vmem:[%s896_s8 + $0xb0] sm:$0xff] %v334_v46  ;;  %v335_v27 = vadd.f32 %v327_v25, %v291_v12  ;;  %v374_v53 = vadd.f32 %v805_v5, %v366_v13  ;;  %v409_v28 = vmul.f32 %v779_v1, %v1062_v8  ;;  %v451_v57 = vmul.f32 %v784_v2, %v1065_v15  ;;  %v1125_v25 = vld [vmem:[%s800_s29 + $0x78] sm:$0xff] }
  0x2d   : > { %v456_v58 = vadd.f32 %v448_v62, %v414_v50  ;;  %v415_v34 = vadd.f32 %v407_v44, %v373_v22  ;;  %v375_v59 = vadd.f32 %v805_v5, %v367_v51  ;;  %v368_v60 = vmul.f32 %v774_v0, %v1073_v47  ;;  %v1136_v62 = vld [vmem:[%s800_s29 + $0x7c] sm:$0xff] }
  0x2e   : > { %630 = vst [vmem:[%s896_s8 + $0xb8] sm:$0xff] %v335_v27  ;;  %v416_v36 = vadd.f32 %v408_v14, %v374_v53  ;;  %v410_v9 = vmul.f32 %v779_v1, %v1081_v20  ;;  %v452_v42 = vmul.f32 %v784_v2, %v1084_v52  ;;  %v369_v10 = vmul.f32 %v774_v0, %v1087_v21 }
  0x2f   : > { %655 = vst [vmem:[%s896_s8 + $0x40] sm:$0xff] %v456_v58  ;;  %v457_v16 = vadd.f32 %v449_v45, %v415_v34  ;;  %v417_v17 = vadd.f32 %v409_v28, %v375_v59  ;;  %v376_v18 = vadd.f32 %v805_v5, %v368_v60  ;;  %v411_v24 = vmul.f32 %v779_v1, %v1096_v29 }
  0x30   : > { %v458_v61 = vadd.f32 %v450_v19, %v416_v36  ;;  %v377_v31 = vadd.f32 %v805_v5, %v369_v10  ;;  %v453_v32 = vmul.f32 %v784_v2, %v1102_v6  ;;  %v370_v33 = vmul.f32 %v774_v0, %v1105_v35 }
  0x31   : > { %656 = vst [vmem:[%s896_s8 + $0x48] sm:$0xff] %v457_v16  ;;  %v459_v39 = vadd.f32 %v451_v57, %v417_v17  ;;  %v418_v40 = vadd.f32 %v410_v9, %v376_v18  ;;  %v412_v44 = vmul.f32 %v779_v1, %v1115_v43  ;;  %v454_v45 = vmul.f32 %v784_v2, %v1118_v48 }
  0x32   : > { %657 = vst [vmem:[%s896_s8 + $0x50] sm:$0xff] %v458_v61  ;;  %v419_v46 = vadd.f32 %v411_v24, %v377_v31  ;;  %v378_v12 = vadd.f32 %v805_v5, %v370_v33  ;;  %v371_v13 = vmul.f32 %v774_v0, %v1125_v25  ;;  %v413_v14 = vmul.f32 %v779_v1, %v1128_v55 }
  0x33   : > { %658 = vst [vmem:[%s896_s8 + $0x58] sm:$0xff] %v459_v39  ;;  %v460_v50 = vadd.f32 %v452_v42, %v418_v40  ;;  %v455_v22 = vmul.f32 %v784_v2, %v1136_v62  ;;  %v380_v19 = vmul.f32 %v790_v3, %v1003_v41  ;;  %v422_v51 = vmul.f32 %v795_v4, %v1006_v7 }
  0x34   : > { %v461_v27 = vadd.f32 %v453_v32, %v419_v46  ;;  %v420_v53 = vadd.f32 %v412_v44, %v378_v12  ;;  %v379_v28 = vadd.f32 %v805_v5, %v371_v13  ;;  %v464_v0 = vmul.f32 %v935_v63, %v1014_v11 }
  0x35   : > { %659 = vst [vmem:[%s896_s8 + $0x60] sm:$0xff] %v460_v50  ;;  %v388_v1 = vadd.f32 %v921_v56, %v380_v19  ;;  %v381_v2 = vmul.f32 %v790_v3, %v1023_v49  ;;  %v423_v41 = vmul.f32 %v795_v4, %v1026_v23  ;;  %v465_v7 = vmul.f32 %v935_v63, %v1029_v54 }
  0x36   : > { %660 = vst [vmem:[%s896_s8 + $0x68] sm:$0xff] %v461_v27  ;;  %v462_v57 = vadd.f32 %v454_v45, %v420_v53  ;;  %v421_v58 = vadd.f32 %v413_v14, %v379_v28  ;;  %v382_v5 = vmul.f32 %v790_v3, %v1039_v26  ;;  %v424_v11 = vmul.f32 %v795_v4, %v1042_v30 }
  0x37   : > { %v430_v34 = vadd.f32 %v422_v51, %v388_v1  ;;  %v389_v59 = vadd.f32 %v921_v56, %v381_v2  ;;  %v466_v49 = vmul.f32 %v935_v63, %v1048_v37  ;;  %v383_v23 = vmul.f32 %v790_v3, %v1051_v38 }
  0x38   : > { %661 = vst [vmem:[%s896_s8 + $0x70] sm:$0xff] %v462_v57  ;;  %v463_v54 = vadd.f32 %v455_v22, %v421_v58  ;;  %v390_v60 = vadd.f32 %v921_v56, %v382_v5  ;;  %v425_v26 = vmul.f32 %v795_v4, %v1062_v8  ;;  %v467_v30 = vmul.f32 %v935_v63, %v1065_v15 }
  0x39   : > { %v472_v36 = vadd.f32 %v464_v0, %v430_v34  ;;  %v431_v9 = vadd.f32 %v423_v41, %v389_v59  ;;  %v391_v42 = vadd.f32 %v921_v56, %v383_v23  ;;  %v384_v37 = vmul.f32 %v790_v3, %v1073_v47 }
  0x3a   : > { %662 = vst [vmem:[%s896_s8 + $0x78] sm:$0xff] %v463_v54  ;;  %v432_v38 = vadd.f32 %v424_v11, %v390_v60  ;;  %v426_v10 = vmul.f32 %v795_v4, %v1081_v20  ;;  %v468_v16 = vmul.f32 %v935_v63, %v1084_v52  ;;  %v385_v8 = vmul.f32 %v790_v3, %v1087_v21 }
  0x3b   : > { %663 = vst [vmem:[%s896_s8 + $0xc0] sm:$0xff] %v472_v36  ;;  %v473_v15 = vadd.f32 %v465_v7, %v431_v9  ;;  %v433_v17 = vadd.f32 %v425_v26, %v391_v42  ;;  %v392_v18 = vadd.f32 %v921_v56, %v384_v37  ;;  %v427_v47 = vmul.f32 %v795_v4, %v1096_v29 }
  0x3c   : > { %v474_v24 = vadd.f32 %v466_v49, %v432_v38  ;;  %v393_v61 = vadd.f32 %v921_v56, %v385_v8  ;;  %v469_v20 = vmul.f32 %v935_v63, %v1102_v6  ;;  %v386_v52 = vmul.f32 %v790_v3, %v1105_v35 }
  0x3d   : > { %664 = vst [vmem:[%s896_s8 + $0xc8] sm:$0xff] %v473_v15  ;;  %v475_v21 = vadd.f32 %v467_v30, %v433_v17  ;;  %v434_v31 = vadd.f32 %v426_v10, %v392_v18  ;;  %v428_v32 = vmul.f32 %v795_v4, %v1115_v43  ;;  %v470_v29 = vmul.f32 %v935_v63, %v1118_v48 }
  0x3e   : > { %665 = vst [vmem:[%s896_s8 + $0xd0] sm:$0xff] %v474_v24  ;;  %v435_v33 = vadd.f32 %v427_v47, %v393_v61  ;;  %v394_v6 = vadd.f32 %v921_v56, %v386_v52  ;;  %v387_v35 = vmul.f32 %v790_v3, %v1125_v25  ;;  %v429_v39 = vmul.f32 %v795_v4, %v1128_v55 }
  0x3f   : > { %666 = vst [vmem:[%s896_s8 + $0xd8] sm:$0xff] %v475_v21  ;;  %v476_v40 = vadd.f32 %v468_v16, %v434_v31  ;;  %v471_v48 = vmul.f32 %v935_v63, %v1136_v62 }
  0x40   : > { %v477_v44 = vadd.f32 %v469_v20, %v435_v33  ;;  %v436_v45 = vadd.f32 %v428_v32, %v394_v6  ;;  %v395_v43 = vadd.f32 %v921_v56, %v387_v35 }
  0x41   : > { %667 = vst [vmem:[%s896_s8 + $0xe0] sm:$0xff] %v476_v40 }
  0x42   : > { %668 = vst [vmem:[%s896_s8 + $0xe8] sm:$0xff] %v477_v44  ;;  %v478_v46 = vadd.f32 %v470_v29, %v436_v45  ;;  %v437_v12 = vadd.f32 %v429_v39, %v395_v43 }
  0x44   : > { %669 = vst [vmem:[%s896_s8 + $0xf0] sm:$0xff] %v478_v46  ;;  %v479_v13 = vadd.f32 %v471_v48, %v437_v12 }
  0x46   : > { %670 = vst [vmem:[%s896_s8 + $0xf8] sm:$0xff] %v479_v13 }
  0x47 PF: > { %s13_s14 = sadd.s32 1, %s729_s14   ;;  %s1234_s12 = smov %s725_s13 }
  0x48   : > { %p10_p5 = scmp.ge.s32.totalorder %s13_s14, 4   ;;  %s1235_s13 = smov %s1237_s15 }
  0x4a   :  { %12 = sbr.rel (!%p10_p5) target bundleno = 2 (0x2), region = 71 }

</bundles_post_ra>
